<compile_context>
chip_gen: v7x
topology: tpu7x:2x2x1
jax: 0.10.0
libtpu: 0.0.40
codegen_flags: <defaults>
</compile_context>

<pallas_src>
import functools

import jax
import jax.numpy as jnp
from jax.experimental import pallas as pl
from jax.experimental.pallas import tpu as pltpu

MAT_DIFF_LOSS_SCALE = 0.001


def _round_up(x, m):
    return ((x + m - 1) // m) * m


def _cdiv(a, b):
    return -(-a // b)


def _loss_kernel(pred_ref, target_ref, trans_ref, out_ref, acc_ref, *,
                 total_b, blocks_per_core, nll_coeff, reg_coeff, precision):
    step = pl.program_id(1)

    @pl.when(step == 0)
    def _init():
        acc_ref[...] = jnp.zeros_like(acc_ref)

    pred = pred_ref[...]          # (TB, C)  f32 log-probs
    target = target_ref[...]      # (TB, 1)  i32
    trans = trans_ref[...]        # (TB, D, D)  f32 or bf16
    TB, C = pred.shape
    D = trans.shape[1]

    # Logical (unclamped) block index -> global row ids; rows >= total_b are masked.
    block = pl.program_id(0) * blocks_per_core + step
    rows = block * TB + jax.lax.broadcasted_iota(jnp.int32, (TB, 1), 0)    # (TB, 1)
    valid = rows < total_b                                                 # (TB, 1) bool

    # ---- NLL:  -pred[i, target[i]]  via one-hot select (masked with where, not multiply) ----
    cols = jax.lax.broadcasted_iota(jnp.int32, (TB, C), 1)
    picked = jnp.sum(jnp.where(cols == target, pred, 0.0),
                     axis=1, keepdims=True)                                # (TB, 1)
    picked = jnp.where(valid, picked, 0.0)

    # ---- regularizer:  ||T T^T - I||_F  per sample (stable off-diag + diag-error split) ----
    # NOTE: packing 2 (v5e) / 4 (v6e,v7x) samples per MXU push would raise MXU fill for D=64;
    # left out here to keep the lowering simple.
    gram = jnp.einsum('bij,bkj->bik', trans, trans,
                      preferred_element_type=jnp.float32,
                      precision=precision)                                 # (TB, D, D) f32
    ri = jax.lax.broadcasted_iota(jnp.int32, (1, D, D), 1)
    ci = jax.lax.broadcasted_iota(jnp.int32, (1, D, D), 2)
    is_diag = ri == ci                                                     # (1, D, D)
    off = jnp.where(is_diag, 0.0, gram)                                    # zeroed diagonal
    diag = jnp.sum(jnp.where(is_diag, gram, 0.0), axis=2)                  # (TB, D)
    dm1 = diag - 1.0
    fro2 = jnp.sum(off * off, axis=2) + dm1 * dm1                          # (TB, D)
    fro2 = jnp.sum(fro2, axis=1, keepdims=True)                            # (TB, 1), >= 0
    fro = jnp.sqrt(jnp.where(valid, fro2, 0.0))                            # mask BEFORE sqrt

    # single fused per-row combine, one scalar accumulator
    acc_ref[...] += jnp.sum(jnp.float32(reg_coeff) * fro
                            - jnp.float32(nll_coeff) * picked)

    @pl.when(step == pl.num_programs(1) - 1)
    def _finalize():
        out_ref[...] = jnp.broadcast_to(acc_ref[...], out_ref.shape)


def get_loss(pred, target, trans_feat, *,
             mat_diff_loss_scale=MAT_DIFF_LOSS_SCALE,
             batch_tile=128, num_cores=2,
             trans_dtype=jnp.bfloat16, vmem_limit_bytes=None):
    """pred: (B, C) f32 log-probs, target: (B,) int, trans_feat: (B, D, D)."""
    pred = pred.astype(jnp.float32)
    target2d = target.astype(jnp.int32).reshape(-1, 1)                     # (B, 1)
    trans_feat = trans_feat.astype(trans_dtype)

    B, C = pred.shape
    D = trans_feat.shape[1]

    # Batch tile: multiple of 8, or exactly B when the whole batch fits in one block
    # (block second-to-last dim equal to the full dim is always legal).  No data padding.
    tile = _round_up(max(int(batch_tile), 8), 8)
    TB = B if B <= tile else tile
    NB = _cdiv(B, TB)                       # logical blocks over the batch
    NC = max(1, min(int(num_cores), NB))    # leading "parallel" axis (2 TCs on v7x)
    SPC = _cdiv(NB, NC)                     # blocks per core (reduction axis)

    precision = (jax.lax.Precision.HIGHEST
                 if trans_feat.dtype == jnp.dtype(jnp.float32) else None)

    kernel = functools.partial(
        _loss_kernel,
        total_b=B,
        blocks_per_core=SPC,
        nll_coeff=1.0 / B,
        reg_coeff=float(mat_diff_loss_scale) / B,
        precision=precision,
    )

    last_block = NB - 1

    def _bidx(c, i):
        # Clamp so an uneven core split never issues an out-of-range block DMA; the
        # in-kernel logical-row mask zeroes the redundant step's contribution.
        return jnp.minimum(c * SPC + i, last_block)

    itemsize = jnp.dtype(trans_feat.dtype).itemsize
    cost = pl.CostEstimate(
        flops=2 * B * D * D * D + 8 * B * D * D,
        transcendentals=B,
        bytes_accessed=B * C * 4 + B * 4 + B * D * D * itemsize + NC * 8 * 128 * 4,
    )

    out = pl.pallas_call(
        kernel,
        out_shape=jax.ShapeDtypeStruct((NC, 8, 128), jnp.float32),
        grid_spec=pltpu.PrefetchScalarGridSpec(
            num_scalar_prefetch=0,
            grid=(NC, SPC),
            in_specs=[
                pl.BlockSpec((TB, C), lambda c, i: (_bidx(c, i), 0)),
                pl.BlockSpec((TB, 1), lambda c, i: (_bidx(c, i), 0)),
                pl.BlockSpec((TB, D, D), lambda c, i: (_bidx(c, i), 0, 0)),
            ],
            out_specs=pl.BlockSpec((1, 8, 128), lambda c, i: (c, 0, 0)),
            scratch_shapes=[pltpu.VMEM((1, 1), jnp.float32)],
        ),
        compiler_params=pltpu.CompilerParams(
            dimension_semantics=("parallel", "arbitrary"),
            vmem_limit_bytes=(int(vmem_limit_bytes) if vmem_limit_bytes else None),
        ),
        cost_estimate=cost,
    )(pred, target2d, trans_feat)

    # tiny cross-core combine (coefficients already applied per step)
    return jnp.sum(out[:, 0, 0])


def _ref_loss(pred, target, trans_feat, scale=MAT_DIFF_LOSS_SCALE):
    """Pure-JAX reference matching the PyTorch module (f32, highest precision)."""
    B = pred.shape[0]
    D = trans_feat.shape[1]
    t = trans_feat.astype(jnp.float32)
    nll = -jnp.mean(pred[jnp.arange(B), target])
    gram = jnp.einsum('bij,bkj->bik', t, t, precision=jax.lax.Precision.HIGHEST)
    reg = jnp.mean(jnp.sqrt(jnp.sum((gram - jnp.eye(D, dtype=jnp.float32)[None]) ** 2,
                                    axis=(1, 2))))
    return nll + reg * scale


if __name__ == "__main__":
    key = jax.random.PRNGKey(0)
    k1, k2, k3, k4, k5, k6 = jax.random.split(key, 6)

    # --- small shapes: batch=2, classes=4, transform dim=8 (single block, f32 path) ---
    B, C, D = 2, 4, 8
    logits = jax.random.normal(k1, (B, C), dtype=jnp.float32)
    pred = jax.nn.log_softmax(logits, axis=-1)
    target = jax.random.randint(k2, (B,), 0, C, dtype=jnp.int32)
    trans_feat = jax.random.normal(k3, (B, D, D), dtype=jnp.float32)

    total_f32 = jax.block_until_ready(
        get_loss(pred, target, trans_feat, trans_dtype=jnp.float32))
    ref = _ref_loss(pred, target, trans_feat)
    assert jnp.allclose(total_f32, ref, rtol=1e-5, atol=1e-5), (total_f32, ref)

    # --- multi-block / multi-core path: B not a multiple of the tile, uneven core split ---
    B2, C2, D2 = 37, 10, 16
    logits2 = jax.random.normal(k4, (B2, C2), dtype=jnp.float32)
    pred2 = jax.nn.log_softmax(logits2, axis=-1)
    target2 = jax.random.randint(k5, (B2,), 0, C2, dtype=jnp.int32)
    trans2 = jax.random.normal(k6, (B2, D2, D2), dtype=jnp.float32)

    loss2_f32 = jax.block_until_ready(
        get_loss(pred2, target2, trans2, batch_tile=16, trans_dtype=jnp.float32))
    ref2 = _ref_loss(pred2, target2, trans2)
    assert jnp.allclose(loss2_f32, ref2, rtol=1e-5, atol=1e-5), (loss2_f32, ref2)

    # --- default bf16-trans path (halved HBM stream, native MXU on v6e/v7x) ---
    # Compare against a reference fed the same bf16-rounded inputs: the only loss is the
    # input rounding; accumulation stays f32 and the stable Frobenius split avoids cancellation.
    loss2_bf16 = jax.block_until_ready(get_loss(pred2, target2, trans2, batch_tile=16))
    ref2_bf16 = _ref_loss(pred2, target2,
                          trans2.astype(jnp.bfloat16).astype(jnp.float32))
    assert jnp.allclose(loss2_bf16, ref2_bf16, rtol=1e-4, atol=1e-4), (loss2_bf16, ref2_bf16)

    print("KERNEL_OK")
</pallas_src>

<mosaic_0001>
module attributes {stable_mosaic.version = 11 : i64} {
  func.func @_loss_kernel(%arg0: i32, %arg1: i32, %arg2: memref<2x4xf32, #tpu.memory_space<vmem>>, %arg3: memref<2x1xi32, #tpu.memory_space<vmem>>, %arg4: memref<2x8x8xf32, #tpu.memory_space<vmem>>, %arg5: memref<1x8x128xf32, #tpu.memory_space<vmem>>, %arg6: memref<1x1xf32, #tpu.memory_space<vmem>>) attributes {dimension_semantics = [#tpu.dimension_semantics<parallel>, #tpu.dimension_semantics<arbitrary>], iteration_bounds = array<i64: 1, 1>, scalar_prefetch = 0 : i64, scratch_operands = 1 : i64, tpu.core_type = #tpu.core_type<tc>, window_params = [{transform_indices = @transform_0, window_bounds = array<i64: 2, 4>}, {transform_indices = @transform_1, window_bounds = array<i64: 2, 1>}, {transform_indices = @transform_2, window_bounds = array<i64: 2, 8, 8>}, {transform_indices = @transform_3, window_bounds = array<i64: 1, 8, 128>}]} {
    %c0_i32 = arith.constant 0 : i32
    %0 = arith.cmpi eq, %arg1, %c0_i32 : i32
    %1 = arith.extui %0 : i1 to i32
    %c0_i32_0 = arith.constant 0 : i32
    %2 = arith.cmpi ne, %1, %c0_i32_0 : i32
    scf.if %2 {
      %cst_27 = arith.constant 0.000000e+00 : f32
      %63 = vector.broadcast %cst_27 : f32 to vector<1x1xf32>
      %c0_28 = arith.constant 0 : index
      %c0_29 = arith.constant 0 : index
      %64 = vector.load %arg6[%c0_28, %c0_29] : memref<1x1xf32, #tpu.memory_space<vmem>>, vector<1x1xf32>
      tpu.vector_store %arg6[%c0_28, %c0_29], %63 {strides = array<i32>} : memref<1x1xf32, #tpu.memory_space<vmem>>, vector<1x1xf32>,
    } else {
    }
    %c0 = arith.constant 0 : index
    %c0_1 = arith.constant 0 : index
    %3 = vector.load %arg2[%c0, %c0_1] : memref<2x4xf32, #tpu.memory_space<vmem>>, vector<2x4xf32>
    %c0_2 = arith.constant 0 : index
    %c0_3 = arith.constant 0 : index
    %4 = vector.load %arg3[%c0_2, %c0_3] : memref<2x1xi32, #tpu.memory_space<vmem>>, vector<2x1xi32>
    %c0_4 = arith.constant 0 : index
    %c0_5 = arith.constant 0 : index
    %c0_6 = arith.constant 0 : index
    %5 = vector.load %arg4[%c0_4, %c0_5, %c0_6] : memref<2x8x8xf32, #tpu.memory_space<vmem>>, vector<2x8x8xf32>
    %c1_i32 = arith.constant 1 : i32
    %6 = arith.muli %arg0, %c1_i32 : i32
    %7 = arith.addi %6, %arg1 : i32
    %c2_i32 = arith.constant 2 : i32
    %8 = arith.muli %7, %c2_i32 : i32
    %9 = tpu.iota {dimensions = array<i32: 0>} : vector<2x1xi32>
    %10 = vector.broadcast %8 : i32 to vector<2x1xi32>
    %11 = arith.addi %10, %9 : vector<2x1xi32>
    %c2_i32_7 = arith.constant 2 : i32
    %12 = vector.broadcast %c2_i32_7 : i32 to vector<2x1xi32>
    %13 = arith.cmpi slt, %11, %12 : vector<2x1xi32>
    %14 = tpu.iota {dimensions = array<i32: 1>} : vector<2x4xi32>
    %15 = vector.broadcast %4 : vector<2x1xi32> to vector<2x4xi32>
    %16 = arith.cmpi eq, %14, %15 : vector<2x4xi32>
    %cst = arith.constant 0.000000e+00 : f32
    %17 = vector.broadcast %cst : f32 to vector<2x4xf32>
    %18 = arith.select %16, %3, %17 : vector<2x4xi1>, vector<2x4xf32>
    %cst_8 = arith.constant dense<0.000000e+00> : vector<2xf32>
    %19 = vector.multi_reduction <add>, %18, %cst_8 [1] : vector<2x4xf32> to vector<2xf32>
    %20 = vector.shape_cast %19 : vector<2xf32> to vector<2x1xf32>
    %cst_9 = arith.constant 0.000000e+00 : f32
    %21 = vector.broadcast %cst_9 : f32 to vector<2x1xf32>
    %22 = arith.select %13, %20, %21 : vector<2x1xi1>, vector<2x1xf32>
    "tpu.trace_start"() <{level = 10 : i32, message = "bij,bkj->bik"}> : () -> ()
    %cst_10 = arith.constant dense<0.000000e+00> : vector<2x8x8xf32>
    %23 = tpu.matmul %5, %5, %cst_10 {dimension_numbers = #tpu.dot_dimension_numbers<[2], [2], [1], [1], [0, 0, 0, 1, 1, 1], [0], [0]>, precision = #tpu.contract_precision<fp32>} : vector<2x8x8xf32>, vector<2x8x8xf32>, vector<2x8x8xf32> -> vector<2x8x8xf32>
    "tpu.trace_stop"() : () -> ()
    %24 = tpu.iota {dimensions = array<i32: 1>} : vector<1x8x8xi32>
    %25 = tpu.iota {dimensions = array<i32: 2>} : vector<1x8x8xi32>
    %26 = arith.cmpi eq, %24, %25 : vector<1x8x8xi32>
    %cst_11 = arith.constant 0.000000e+00 : f32
    %27 = vector.shape_cast %26 : vector<1x8x8xi1> to vector<1x8x8xi1>
    %28 = vector.broadcast %27 : vector<1x8x8xi1> to vector<2x8x8xi1>
    %29 = vector.broadcast %cst_11 : f32 to vector<2x8x8xf32>
    %30 = arith.select %28, %29, %23 : vector<2x8x8xi1>, vector<2x8x8xf32>
    %cst_12 = arith.constant 0.000000e+00 : f32
    %31 = vector.shape_cast %26 : vector<1x8x8xi1> to vector<1x8x8xi1>
    %32 = vector.broadcast %31 : vector<1x8x8xi1> to vector<2x8x8xi1>
    %33 = vector.broadcast %cst_12 : f32 to vector<2x8x8xf32>
    %34 = arith.select %32, %23, %33 : vector<2x8x8xi1>, vector<2x8x8xf32>
    %cst_13 = arith.constant dense<0.000000e+00> : vector<2x8xf32>
    %35 = vector.multi_reduction <add>, %34, %cst_13 [2] : vector<2x8x8xf32> to vector<2x8xf32>
    %cst_14 = arith.constant 1.000000e+00 : f32
    %36 = vector.broadcast %cst_14 : f32 to vector<2x8xf32>
    %37 = arith.subf %35, %36 : vector<2x8xf32>
    %38 = arith.mulf %30, %30 : vector<2x8x8xf32>
    %cst_15 = arith.constant dense<0.000000e+00> : vector<2x8xf32>
    %39 = vector.multi_reduction <add>, %38, %cst_15 [2] : vector<2x8x8xf32> to vector<2x8xf32>
    %40 = arith.mulf %37, %37 : vector<2x8xf32>
    %41 = arith.addf %39, %40 : vector<2x8xf32>
    %cst_16 = arith.constant dense<0.000000e+00> : vector<2xf32>
    %42 = vector.multi_reduction <add>, %41, %cst_16 [1] : vector<2x8xf32> to vector<2xf32>
    %43 = vector.shape_cast %42 : vector<2xf32> to vector<2x1xf32>
    %cst_17 = arith.constant 0.000000e+00 : f32
    %44 = vector.broadcast %cst_17 : f32 to vector<2x1xf32>
    %45 = arith.select %13, %43, %44 : vector<2x1xi1>, vector<2x1xf32>
    %46 = math.sqrt %45 : vector<2x1xf32>
    %c0_18 = arith.constant 0 : index
    %c0_19 = arith.constant 0 : index
    %47 = vector.load %arg6[%c0_18, %c0_19] : memref<1x1xf32, #tpu.memory_space<vmem>>, vector<1x1xf32>
    %cst_20 = arith.constant 5.000000e-04 : f32
    %48 = vector.broadcast %cst_20 : f32 to vector<2x1xf32>
    %49 = arith.mulf %48, %46 : vector<2x1xf32>
    %cst_21 = arith.constant 5.000000e-01 : f32
    %50 = vector.broadcast %cst_21 : f32 to vector<2x1xf32>
    %51 = arith.mulf %50, %22 : vector<2x1xf32>
    %52 = arith.subf %49, %51 : vector<2x1xf32>
    %53 = vector.shape_cast %52 : vector<2x1xf32> to vector<1x2x1xf32>
    %cst_22 = arith.constant dense<0.000000e+00> : vector<1xf32>
    %54 = vector.multi_reduction <add>, %53, %cst_22 [1, 2] : vector<1x2x1xf32> to vector<1xf32>
    %55 = vector.shape_cast %54 : vector<1xf32> to vector<1x1x1xf32>
    %56 = vector.extract %55[0, 0, 0] : f32 from vector<1x1x1xf32>
    %57 = vector.broadcast %56 : f32 to vector<1x1xf32>
    %58 = arith.addf %47, %57 : vector<1x1xf32>
    %c0_23 = arith.constant 0 : index
    %c0_24 = arith.constant 0 : index
    %59 = vector.load %arg6[%c0_23, %c0_24] : memref<1x1xf32, #tpu.memory_space<vmem>>, vector<1x1xf32>
    tpu.vector_store %arg6[%c0_23, %c0_24], %58 {strides = array<i32>} : memref<1x1xf32, #tpu.memory_space<vmem>>, vector<1x1xf32>,
    %c0_i32_25 = arith.constant 0 : i32
    %60 = arith.cmpi eq, %arg1, %c0_i32_25 : i32
    %61 = arith.extui %60 : i1 to i32
    %c0_i32_26 = arith.constant 0 : i32
    %62 = arith.cmpi ne, %61, %c0_i32_26 : i32
    scf.if %62 {
      %c0_27 = arith.constant 0 : index
      %c0_28 = arith.constant 0 : index
      %63 = vector.load %arg6[%c0_27, %c0_28] : memref<1x1xf32, #tpu.memory_space<vmem>>, vector<1x1xf32>
      %64 = vector.shape_cast %63 : vector<1x1xf32> to vector<1x1x1xf32>
      %65 = vector.broadcast %64 : vector<1x1x1xf32> to vector<1x8x128xf32>
      %c0_29 = arith.constant 0 : index
      %c0_30 = arith.constant 0 : index
      %c0_31 = arith.constant 0 : index
      %66 = vector.load %arg5[%c0_29, %c0_30, %c0_31] : memref<1x8x128xf32, #tpu.memory_space<vmem>>, vector<1x8x128xf32>
      tpu.vector_store %arg5[%c0_29, %c0_30, %c0_31], %65 {strides = array<i32>} : memref<1x8x128xf32, #tpu.memory_space<vmem>>, vector<1x8x128xf32>,
    } else {
    }
    return
  }
  func.func @transform_0(%arg0: i32, %arg1: i32) -> (i32, i32) {
    %c1_i32 = arith.constant 1 : i32
    %0 = arith.muli %arg0, %c1_i32 : i32
    %1 = arith.addi %0, %arg1 : i32
    %c0_i32 = arith.constant 0 : i32
    %2 = arith.minsi %1, %c0_i32 : i32
    %c0_i32_0 = arith.constant 0 : i32
    %c0_i32_1 = arith.constant 0 : i32
    return %2, %c0_i32_0 : i32, i32
  }
  func.func @transform_1(%arg0: i32, %arg1: i32) -> (i32, i32) {
    %c1_i32 = arith.constant 1 : i32
    %0 = arith.muli %arg0, %c1_i32 : i32
    %1 = arith.addi %0, %arg1 : i32
    %c0_i32 = arith.constant 0 : i32
    %2 = arith.minsi %1, %c0_i32 : i32
    %c0_i32_0 = arith.constant 0 : i32
    %c0_i32_1 = arith.constant 0 : i32
    return %2, %c0_i32_0 : i32, i32
  }
  func.func @transform_2(%arg0: i32, %arg1: i32) -> (i32, i32, i32) {
    %c1_i32 = arith.constant 1 : i32
    %0 = arith.muli %arg0, %c1_i32 : i32
    %1 = arith.addi %0, %arg1 : i32
    %c0_i32 = arith.constant 0 : i32
    %2 = arith.minsi %1, %c0_i32 : i32
    %c0_i32_0 = arith.constant 0 : i32
    %c0_i32_1 = arith.constant 0 : i32
    %c0_i32_2 = arith.constant 0 : i32
    return %2, %c0_i32_0, %c0_i32_1 : i32, i32, i32
  }
  func.func @transform_3(%arg0: i32, %arg1: i32) -> (i32, i32, i32) {
    %c0_i32 = arith.constant 0 : i32
    %c0_i32_0 = arith.constant 0 : i32
    %c0_i32_1 = arith.constant 0 : i32
    return %arg0, %c0_i32, %c0_i32_0 : i32, i32, i32
  }
}

</mosaic_0001>

<bundles_post_ra>
// kernel: tpu_custom_call.1
= control target key start
LH: loop header
LB: loop body
LE: loop exit
PB: predicated region body
PF: predicated region fallthrough
CT: control target
= control target key end

     0   :  { %8 = vsyncpa [#allocation4], 0  ;;  %s1403_s0 = inlined_call_operand.vmem [shape: f32[2,4], index: 0, kind: input, shape index: {}]   ;;  %s1404_s1 = inlined_call_operand.vmem [shape: s32[2,1], index: 1, kind: input, shape index: {}]   ;;  %s1405_s2 = inlined_call_operand.hbm [shape: f32[2,8,8], index: 2, kind: input, shape index: {}]   ;;  %s1406_s3 = inlined_call_operand.hbm [shape: f32[1,8,128], index: 3, kind: output, shape index: {}]  }
   0x1   :  { %9 = vsyncpa [#allocation5], 0  ;;  %s1303_s12 = smov [#allocation3]   ;;  %s1255_s16 = scalar_lea.hbm %s1405_s2, 256 }
   0x2   :  { %s45_s13 = sshll.u32 %s1303_s12, 4  ;;  %p1256_p0 = scmp.ne.s32.totalorder %s1405_s2, %s1255_s16  ;;  %s46_s13 = int_to_ptr.vmem [resolvable:$true] %s45_s13 }
   0x3   :  { %p1259_p1 = scmp.lt.u32.totalorder %s1255_s16, %s1405_s2 }
   0x5   :  { %p1261_p2 = pnand %p1259_p1, %p1256_p0 }
   0x7   :  { %1264 = shalt.err (!%p1261_p2)
}
   0x8   :  { %s1265_s21 = scalar_lea.vmem %s46_s13, 256  ;;  %p1270_p4 = scmp.lt.s32.totalorder %s46_s13, %s46_s13 }
   0x9   :  { %p1266_p3 = scmp.ne.s32.totalorder %s46_s13, %s1265_s21  ;;  %p1271_p5 = scmp.lt.s32.totalorder %s1265_s21, %s1265_s21 }
   0xb   :  { %p1272_p6 = por %p1271_p5, %p1270_p4 }
   0xd   :  { %p1273_p7 = pnand %p1272_p6, %p1266_p3 }
   0xf   :  { %1276 = shalt.err (!%p1273_p7)
}
  0x10   :  { %s1304_s22 = smov 128   ;;  %s1305_s23 = smov 8  }
  0x11   :  { %51 = dma.hbm_to_vmem [thread:$0]  %s1405_s2, 256, %s46_s13, [#allocation4], %s1304_s22, %s1304_s22, %s1305_s23  }
  0x12   :  { %1299 = dma.done.wait [#allocation4], 256  }
  0x13   :  { %1300 = vsyncadd [#allocation4], 4294967040  ;;  %v1306_v0 = vmov 0.0   ;;  %vm1307_vm0 = vmmov 0   ;;  %vm122_vm1 = vcmask 64512   ;;  %v101_v1 = vld [vmem:[#allocation3] sm:$0xff]  ;;  %v105_v16 = vlaneseq }
  0x14   :  { %1162 = vmatprep.subr.mxu0 %v1306_v0  ;;  %1192 = vmatprep.subr.mxu1 %v1306_v0  ;;  %v102_v2 = vld [vmem:[#allocation3 + $0x8] sm:$0xff]  ;;  %v124_v3 = vsel %vm122_vm1, %v101_v1, 0  ;;  %v1308_v15 = vmov 0   ;;  %v100_v33 = vld [vmem:[%s1404_s1] sm:$0x3]  ;;  %vm1058_vm3 = vcmask 1041409  }
  0x15   :  { %1164 = vmatprep.mubr.msk.f32.mxu0 %vm1307_vm0, %v1306_v0  ;;  %1194 = vmatprep.mubr.msk.f32.mxu1 %vm1307_vm0, %v1306_v0  ;;  %v573_v4 = vsel %vm122_vm1, %v102_v2, 0  ;;  %v127_v5 = vand.u32 4294901760, %v124_v3  ;;  %v106_v17 = vshrl.u32 %v105_v16, 7  ;;  %v111_v18 = vand.u32 127, %v105_v16  ;;  %v99_v47 = vld [vmem:[%s1403_s0] sm:$0x3] }
  0x16   :  { %v576_v6 = vand.u32 4294901760, %v573_v4  ;;  %1251 = vset.pattern.permute.xlu0 %v1308_v15  ;;  %1252 = vset.pattern.permute.xlu1 %v1308_v15  ;;  %vm1061_vm4 = vcmask 58368   ;;  %vm117_vm6 = vcmask 25600   ;;  %vm1077_vm10 = vcmask 1024   ;;  %s1309_s1 = smov [#allocation6]  }
  0x17   :  { %1163 = vmatpush3.xpose.msra.mxu0 %v127_v5  ;;  %v193_v7 = vsub.f32 %v124_v3, %v127_v5  ;;  %vm1021_vm2 = vcmp.eq.s32.totalorder %v106_v17, %v111_v18  ;;  %v1052_v40 = vsub.s32 %v111_v18, %v106_v17  ;;  %vm109_vm7 = vcmp.lt.s32.totalorder %v106_v17, 2  ;;  %s1112_s29 = sshll.u32 %s1309_s1, 4  ;;  %s1113_s29 = int_to_ptr.vmem [resolvable:$true] %s1112_s29 }
  0x18   :  { %1193 = vmatpush3.xpose.msra.mxu1 %v576_v6  ;;  %v642_v8 = vsub.f32 %v573_v4, %v576_v6  ;;  %1167 = vmatprep.subr.mxu0 %v1306_v0  ;;  %vm97_vm11 = vcmask 0   ;;  %s1277_s30 = scalar_lea.vmem %s1113_s29, 128  ;;  %p1282_p9 = scmp.lt.s32.totalorder %s1113_s29, %s1113_s29 }
  0x19   :  { %1197 = vmatprep.subr.mxu1 %v1306_v0  ;;  %v194_v9 = vand.u32 4294901760, %v193_v7  ;;  %98 = vst.msk [vmem:[#allocation2] sm:$0x1] %vm97_vm11, %v1306_v0  ;;  %p1278_p8 = scmp.ne.s32.totalorder %s1113_s29, %s1277_s30  ;;  %p1283_p10 = scmp.lt.s32.totalorder %s1277_s30, %s1277_s30 }
  0x1a   :  { %v643_v10 = vand.u32 4294901760, %v642_v8 }
  0x1b   :  { %v195_v11 = vsub.f32 %v193_v7, %v194_v9  ;;  %p1284_p11 = por %p1283_p10, %p1282_p9 }
  0x1c   :  { %v644_v12 = vsub.f32 %v642_v8, %v643_v10 }
  0x1d   :  { %v196_v13 = vand.u32 4294901760, %v195_v11  ;;  %p1285_p12 = pnand %p1284_p11, %p1278_p8 }
  0x1e   :  { %v645_v14 = vand.u32 4294901760, %v644_v12 }
  0x1f   :  { %1165 = vmatmul.mubr.f32.vlgmr.msra.gmra.mrb[0].mxu0 %v196_v13 }
  0x20   :  { %1195 = vmatmul.mubr.f32.vlgmr.msra.gmra.mrb[0].mxu1 %v645_v14  ;;  %1168 = vmatpush3.xpose.msra.mxu0 %v196_v13 }
  0x21   :  { %1198 = vmatpush3.xpose.msra.mxu1 %v645_v14  ;;  %1169 = vmatprep.mubr.msk.f32.mxu0 %vm1307_vm0, %v1306_v0 }
  0x22   :  { %1172 = vmatprep.subr.mxu0 %v1306_v0  ;;  %1199 = vmatprep.mubr.msk.f32.mxu1 %vm1307_vm0, %v1306_v0 }
  0x23   :  { %1202 = vmatprep.subr.mxu1 %v1306_v0 }
  0x27   :  { %1170 = vmatmul.mubr.f32.vlgmr.msra.gmra.mrb[0].mxu0 %v127_v5 }
  0x28   :  { %1200 = vmatmul.mubr.f32.vlgmr.msra.gmra.mrb[0].mxu1 %v576_v6  ;;  %1173 = vmatpush3.xpose.msra.mxu0 %v193_v7 }
  0x29   :  { %1203 = vmatpush3.xpose.msra.mxu1 %v642_v8  ;;  %1174 = vmatprep.mubr.msk.f32.mxu0 %vm1307_vm0, %v1306_v0 }
  0x2a   :  { %1177 = vmatprep.subr.mxu0 %v1306_v0  ;;  %1204 = vmatprep.mubr.msk.f32.mxu1 %vm1307_vm0, %v1306_v0 }
  0x2b   :  { %1207 = vmatprep.subr.mxu1 %v1306_v0 }
  0x2f   :  { %1175 = vmatmul.mubr.f32.vlgmr.msra.gmra.mrb[0].mxu0 %v193_v7 }
  0x30   :  { %1205 = vmatmul.mubr.f32.vlgmr.msra.gmra.mrb[0].mxu1 %v642_v8  ;;  %1178 = vmatpush3.xpose.msra.mxu0 %v127_v5 }
  0x31   :  { %1208 = vmatpush3.xpose.msra.mxu1 %v576_v6  ;;  %1179 = vmatprep.mubr.msk.f32.mxu0 %vm1307_vm0, %v1306_v0 }
  0x32   :  { %1182 = vmatprep.subr.mxu0 %v1306_v0  ;;  %1209 = vmatprep.mubr.msk.f32.mxu1 %vm1307_vm0, %v1306_v0 }
  0x33   :  { %1212 = vmatprep.subr.mxu1 %v1306_v0 }
  0x37   :  { %1180 = vmatmul.mubr.f32.vlgmr.msra.gmra.mrb[0].mxu0 %v194_v9 }
  0x38   :  { %1210 = vmatmul.mubr.f32.vlgmr.msra.gmra.mrb[0].mxu1 %v643_v10  ;;  %1183 = vmatpush3.xpose.msra.mxu0 %v194_v9 }
  0x39   :  { %1213 = vmatpush3.xpose.msra.mxu1 %v643_v10  ;;  %1184 = vmatprep.mubr.msk.f32.mxu0 %vm1307_vm0, %v1306_v0  ;;  %v1073_v10 = vld [vmem:[#allocation2] sm:$0x1] }
  0x3a   :  { %1187 = vmatprep.subr.mxu0 %v1306_v0  ;;  %1214 = vmatprep.mubr.msk.f32.mxu1 %vm1307_vm0, %v1306_v0 }
  0x3b   :  { %1217 = vmatprep.subr.mxu1 %v1306_v0 }
  0x3f   :  { %1185 = vmatmul.mubr.f32.vlgmr.msra.gmra.mrb[0].mxu0 %v127_v5 }
  0x40   :  { %1215 = vmatmul.mubr.f32.vlgmr.msra.gmra.mrb[0].mxu1 %v576_v6  ;;  %1188 = vmatpush3.xpose.msra.mxu0 %v127_v5 }
  0x41   :  { %1218 = vmatpush3.xpose.msra.mxu1 %v576_v6  ;;  %1189 = vmatprep.mubr.msk.f32.mxu0 %vm1307_vm0, %v1306_v0 }
  0x42   :  { %1219 = vmatprep.mubr.msk.f32.mxu1 %vm1307_vm0, %v1306_v0 }
  0x47   :  { %1190 = vmatmul.mubr.f32.vlgmr.msra.gmra.mrb[0].mxu0 %v127_v5 }
  0x48   :  { %1220 = vmatmul.mubr.f32.vlgmr.msra.gmra.mrb[0].mxu1 %v576_v6 }
 0x11a   :  { %v568_v19 = vpop.f32.mrb[0].mxu0 }
 0x11b   :  { %v1017_v20 = vpop.f32.mrb[0].mxu1  ;;  %v1024_v21 = vsel %vm1021_vm2, 0.0, %v568_v19  ;;  %v1191_v23 = vpop.f32.mrb[1].mxu0  ;;  %v1026_v25 = vsel %vm1021_vm2, %v568_v19, 0.0 }
 0x11c   :  { %v1025_v22 = vsel %vm1021_vm2, 0.0, %v1017_v20  ;;  %v1221_v24 = vpop.f32.mrb[1].mxu1  ;;  %v1028_v26 = vsel %vm122_vm1, %v1026_v25, 0.0  ;;  %v1036_v27 = vmul.f32 %v1024_v21, %v1024_v21  ;;  %v1027_v28 = vsel %vm1021_vm2, %v1017_v20, 0.0 }
 0x11d   :  { %1029 = vadd.xlane.f32.xlu0 %v1028_v26  ;;  %v1037_v29 = vmul.f32 %v1025_v22, %v1025_v22  ;;  %v1031_v31 = vsel %vm122_vm1, %v1027_v28, 0.0 }
 0x11e   :  { %v1038_v30 = vsel %vm122_vm1, %v1036_v27, 0.0 }
 0x11f   :  { %1039 = vadd.xlane.f32.xlu1 %v1038_v30  ;;  %v1041_v32 = vsel %vm122_vm1, %v1037_v29, 0.0 }
 0x121   :  { %1032 = vadd.xlane.f32.xlu0 %v1031_v31 }
 0x123   :  { %1042 = vadd.xlane.f32.xlu1 %v1041_v32 }
 0x137   :  { %113 = vperm.xlu0 %1251, %v100_v33  }
 0x1aa   :  { %v1030_v34 = vpop.xlane.xlu0 %1029 }
 0x1ab   :  { %v1135_v35 = vadd.f32 -1.0, %v1030_v34 }
 0x1ac   :  { %v1040_v36 = vpop.xlane.xlu1 %1039 }
 0x1ad   :  { %v1044_v37 = vmul.f32 %v1135_v35, %v1135_v35 }
 0x1ae   :  { %v1033_v38 = vpop.xlane.xlu0 %1032 }
 0x1af   :  { %v1136_v39 = vadd.f32 -1.0, %v1033_v38  ;;  %v1046_v41 = vadd.f32 %v1044_v37, %v1040_v36 }
 0x1b0   :  { %v1043_v43 = vpop.xlane.xlu1 %1042 }
 0x1b1   :  { %v1045_v42 = vmul.f32 %v1136_v39, %v1136_v39  ;;  %v1053_v45 = vrot.slane %v1046_v41, %v1052_v40 }
 0x1b3   :  { %v1047_v44 = vadd.f32 %v1045_v42, %v1043_v43 }
 0x1b5   :  { %v1057_v46 = vrot.slane %v1047_v44, %v1052_v40 }
 0x1b6   :  { %v114_v48 = vpop.permute.xlu0 %113 }
 0x1b7   :  { %v1059_v49 = vsel %vm1058_vm3, %v1057_v46, %v1053_v45  ;;  %vm115_vm5 = vcmp.eq.s32.totalorder %v111_v18, %v114_v48 }
 0x1b8   :  { %v1062_v50 = vsel %vm1061_vm4, %v1059_v49, 0.0  ;;  %v116_v51 = vsel %vm115_vm5, %v99_v47, 0.0 }
 0x1b9   :  { %1063 = vadd.xlane.f32.xlu1 %v1062_v50  ;;  %v118_v52 = vsel %vm117_vm6, %v116_v51, 0.0 }
 0x1bd   :  { %119 = vadd.xlane.f32.xlu1 %v118_v52 }
 0x246   :  { %v1064_v53 = vpop.xlane.xlu1 %1063 }
 0x247   :  { %v1065_v54 = vsel %vm109_vm7, %v1064_v53, 0.0 }
 0x248   :  { %1253 = vrsqrt.f32 %v1065_v54  ;;  %vm1068_vm8 = vcmp.eq.f32.partialorder %v1065_v54, inf  ;;  %v1071_v59 = vand.u32 2147483648, %v1065_v54  ;;  %vm1070_vm9 = vcmp.eq.f32.partialorder %v1065_v54, 0.0 }
 0x24a   :  { %v120_v55 = vpop.xlane.xlu1 %119 }
 0x24b   :  { %v121_v57 = vsel %vm109_vm7, %v120_v55, 0.0 }
 0x24c   :  { %v1075_v60 = vmul.f32 0.5, %v121_v57 }
 0x252   :  { %v1254_v56 = vpop.eup %1253 }
 0x253   :  { %v1067_v58 = vmul.f32 %v1254_v56, %v1065_v54 }
 0x255   :  { %v1069_v61 = vsel %vm1068_vm8, %v1065_v54, %v1067_v58 }
 0x256   :  { %v1072_v62 = vsel %vm1070_vm9, %v1071_v59, %v1069_v61 }
 0x257   :  { %v1074_v63 = vmul.f32 0.0005, %v1072_v62 }
 0x259   :  { %v1076_v1 = vsub.f32 %v1074_v63, %v1075_v60 }
 0x25b   :  { %v1078_v2 = vsel %vm1077_vm10, %v1076_v1, 0.0 }
 0x25c   :  { %1079 = vadd.xlane.f32.xlu1 %v1078_v2 }
 0x2e9   :  { %v1080_v3 = vpop.xlane.xlu1 %1079 }
 0x2ea   :  { %v1081_v4 = vrot.slane %v1080_v3, 4 }
 0x2ec   :  { %v1082_v5 = vadd.f32 %v1081_v4, %v1080_v3 }
 0x2ee   :  { %v1083_v6 = vrot.slane %v1082_v5, 2 }
 0x2f0   :  { %v1084_v7 = vadd.f32 %v1083_v6, %v1082_v5 }
 0x2f2   :  { %v1085_v8 = vrot.slane %v1084_v7, 1 }
 0x2f4   :  { %v1086_v9 = vadd.f32 %v1085_v8, %v1084_v7 }
 0x2f6   :  { %1242 = vpush %v1086_v9 }
 0x327   :  { %s1243_s0 = spop %1242 }
 0x328   :  { %v1088_v11 = vstv %s1243_s0 }
 0x329   :  { %v1089_v12 = vadd.f32 %v1088_v11, %v1073_v10 }
 0x32b   :  { %1091 = vst.msk [vmem:[#allocation2] sm:$0x1] %vm97_vm11, %v1089_v12 }
 0x332   :  { %v1137_v13 = vld [vmem:[#allocation2] ss:$0 sm:$0xff] }
 0x333   :  { %1102 = vperm.xlu1 %1252, %v1137_v13  }
 0x3b2   :  { %v1103_v14 = vpop.permute.xlu1 %1102 }
 0x3b3   :  { %1105 = vst [vmem:[#allocation6] sm:$0xff] %v1103_v14 }
 0x3b4   :  { %1288 = shalt.err (!%p1285_p12)
}
 0x3b5   :  { %s1289_s6 = scalar_lea.hbm %s1406_s3, 128 }
 0x3b6   :  { %p1290_p13 = scmp.ne.s32.totalorder %s1406_s3, %s1289_s6  ;;  %p1293_p0 = scmp.lt.u32.totalorder %s1289_s6, %s1406_s3 }
 0x3b8   :  { %p1295_p1 = pnand %p1293_p0, %p1290_p13 }
 0x3ba   :  { %1298 = shalt.err (!%p1295_p1)
}
 0x3bb   :  { %1115 = dma.vmem_to_hbm [thread:$0]  %s1113_s29, 128, %s1406_s3, [#allocation5]  }
 0x3bc   :  { %1301 = dma.done.wait [#allocation5], 128  }
 0x3bd   :  { %1302 = vsyncadd [#allocation5], 4294967168 }
 0x3be   :  { %1119 = vsyncpa [#allocation4], 1 }
 0x3bf   :  { %1120 = vsyncpa [#allocation5], 1 }

</bundles_post_ra>
